<compile_context>
chip_gen: v6e
topology: v6e:2x2x1
jax: 0.10.0
libtpu: 0.0.40
codegen_flags: <defaults>
</compile_context>

<pallas_src>
import functools

import numpy as np

import jax
import jax.numpy as jnp
from jax import lax
from jax.experimental import pallas as pl
from jax.experimental.pallas import tpu as pltpu

_LANE = 128
_SUBLANE = 8
_POINT_ALIGN = _LANE * _SUBLANE          # 1024: chunk axis stays a multiple of 8
_TILE_INPUT_BUDGET = 6 * 1024 * 1024     # per-step input bytes (pre double-buffering)
_VMEM_LIMIT = 32 * 1024 * 1024           # scoped VMEM limit, safe on v5e/v6e/v7x

# Host-side reference only (never captured by a kernel).
_R_FLIP_SIGN = np.array([1, -1, -1, 1, -1, -1, 1, -1, -1],
                        dtype=np.float32).reshape(1, 9, 1)


def _round_up(x, m):
    return ((x + m - 1) // m) * m


def _as_point_chunks(x, valid, pad_value=0, tail_masked=False):
    """View (or pad+copy) the trailing point axis as (chunks, 128).

    The kernels visit round_up(valid, 1024) points.  The reshape is zero-copy
    whenever the existing extent is 128-aligned and covers the visited region
    and either there is no pad region or contributions past `valid` are masked
    elsewhere (`tail_masked`, e.g. pred_* cancelled by zero-padded scene_score).
    Otherwise one slice+pad copy is made (only for non-aligned shapes).
    """
    n = x.shape[-1]
    vpad = _round_up(valid, _POINT_ALIGN)
    reuse = (n % _LANE == 0) and (n >= vpad) and (tail_masked or valid == vpad)
    if not reuse:
        y = x[..., :valid]
        if vpad > valid:
            y = jnp.pad(y, [(0, 0)] * (x.ndim - 1) + [(0, vpad - valid)],
                        constant_values=pad_value)
        x = y
    chunks = x.shape[-1] // _LANE
    return x.reshape(x.shape[:-1] + (chunks, _LANE)), vpad // _LANE


def _choose_chunk_tile(n_chunks, bytes_per_chunk,
                       budget=_TILE_INPUT_BUDGET, min_grid=2):
    """Largest multiple-of-8 divisor of n_chunks whose tile fits the per-step
    input budget, preferring >= min_grid steps (v7x dual-TensorCore sharding)."""
    assert n_chunks % _SUBLANE == 0
    cap = (budget // max(bytes_per_chunk, 1)) // _SUBLANE * _SUBLANE
    if n_chunks >= min_grid * _SUBLANE:
        cap = min(cap, (n_chunks // min_grid) // _SUBLANE * _SUBLANE)
    cap = max(_SUBLANE, min(cap, n_chunks))
    t = cap
    while n_chunks % t:
        t -= _SUBLANE
    return t, n_chunks // t


def _cls_loss_kernel(logits_ref, labels_ref, out_ref, *, neg_weight):
    """Per-tile, per-lane partial sums of the weighted cross-entropy."""
    logits = logits_ref[...].astype(jnp.float32)      # (B, C, TC, 128)
    labels = labels_ref[...].astype(jnp.int32)        # (B, TC, 128)
    num_classes = logits.shape[1]

    # Channel (axis=1) reductions are over a non-minor axis -> cheap VPU ops.
    m = jnp.max(logits, axis=1)                                        # (B, TC, 128)
    lse = jnp.log(jnp.sum(jnp.exp(logits - m[:, None]), axis=1)) + m   # (B, TC, 128)

    cls_iota = lax.broadcasted_iota(jnp.int32, (1, num_classes, 1, 1), 1)
    onehot = (cls_iota == labels[:, None]).astype(jnp.float32)         # (B, C, TC, 128)
    tgt = jnp.sum(logits * onehot, axis=1)                             # (B, TC, 128)

    # Padded points carry label -1 -> weight 0 -> no contribution.
    w = jnp.where(labels < 0, 0.0,
                  jnp.where(labels == 0, jnp.float32(neg_weight), 1.0))

    nll_lane = jnp.sum(w * (lse - tgt), axis=(0, 1))   # (128,) per-lane partials
    w_lane = jnp.sum(w, axis=(0, 1))                   # (128,)
    out_ref[0:1, 0:1, :] = nll_lane.reshape(1, 1, _LANE)
    out_ref[0:1, 1:2, :] = w_lane.reshape(1, 1, _LANE)


def _frame_loss_kernel(pred_r_ref, gt_r_ref, pred_t_ref, gt_t_ref, score_ref,
                       out_ref):
    """Per-tile, per-lane partial sums of the rotation / translation losses."""
    pr = pred_r_ref[...].astype(jnp.float32)     # (B, 9, TC, 128)
    gr = gt_r_ref[...].astype(jnp.float32)       # (B, 9, TC, 128)
    pt = pred_t_ref[...].astype(jnp.float32)     # (B, 3, TC, 128)
    gtt = gt_t_ref[...].astype(jnp.float32)      # (B, 3, TC, 128)
    score = score_ref[...].astype(jnp.float32)   # (B, TC, 128)

    # Flip mask for the symmetric frame (channels 1,2,4,5,7,8), built in-kernel
    # from an iota so the kernel captures no array constants.
    ch = lax.broadcasted_iota(jnp.int32, (1, 9, 1, 1), 1)
    flip = ((ch != 0) & (ch != 3) & (ch != 6)).astype(jnp.float32)

    # min over the two frame orientations, factored:
    #   min(sum (p-g)^2, sum (p-g_inv)^2) = sum d^2 + 4*min(0, sum_{flipped} p*g)
    d = pr - gr
    d2_sum = jnp.sum(d * d, axis=1)                                   # (B, TC, 128)
    cross = jnp.sum(pr * gr * flip, axis=1)                           # (B, TC, 128)
    r_min = (d2_sum + 4.0 * jnp.minimum(cross, 0.0)) * jnp.float32(1.0 / 9.0)

    dt = pt - gtt
    t_pt = jnp.sum(dt * dt, axis=1)                                   # (B, TC, 128)

    r_lane = jnp.sum(r_min * score, axis=(0, 1))   # (128,)
    t_lane = jnp.sum(t_pt * score, axis=(0, 1))    # (128,)
    out_ref[0:1, 0:1, :] = r_lane.reshape(1, 1, _LANE)
    out_ref[0:1, 1:2, :] = t_lane.reshape(1, 1, _LANE)


def pointnet2_loss(preds, labels, *, label_smoothing=0, neg_weight=0.1,
                   r_weight=5.0, t_weight=20.0, cls_weight=1.0):
    # TODO(synk): label_smoothing > 0 branch (smooth_cross_entropy) not
    # implemented; the module's default configuration (label_smoothing=0) is
    # reproduced here.
    assert label_smoothing == 0

    logits = preds['scene_score_logits']          # (B, C, N)
    score_labels = labels['scene_score_labels']   # (B, N)   integer
    pred_r = preds['frame_R']                     # (B, 9, >= M)
    pred_t = preds['frame_t']                     # (B, 3, >= M)
    gt_r = labels['best_frame_R']                 # (B, 9, M)
    gt_t = labels['best_frame_t']                 # (B, 3, M)
    score = labels['scene_score']                 # (B, >= M)

    batch, num_classes, num_points = logits.shape
    num_frame_points = gt_r.shape[2]

    # ------------------------------------------------ weighted cross-entropy
    logits_c, nc_cls = _as_point_chunks(logits, num_points)
    labels_c, _ = _as_point_chunks(score_labels, num_points, pad_value=-1)

    bpc_cls = 4 * _LANE * batch * (num_classes + 1)
    tc, gn = _choose_chunk_tile(nc_cls, bpc_cls)

    cls_partials = pl.pallas_call(
        functools.partial(_cls_loss_kernel, neg_weight=neg_weight),
        grid=(gn,),
        in_specs=[
            pl.BlockSpec((batch, num_classes, tc, _LANE), lambda i: (0, 0, i, 0)),
            pl.BlockSpec((batch, tc, _LANE), lambda i: (0, i, 0)),
        ],
        out_specs=pl.BlockSpec((1, _SUBLANE, _LANE), lambda i: (i, 0, 0)),
        out_shape=jax.ShapeDtypeStruct((gn, _SUBLANE, _LANE), jnp.float32),
        compiler_params=pltpu.CompilerParams(
            dimension_semantics=("parallel",),
            vmem_limit_bytes=_VMEM_LIMIT),
        cost_estimate=pl.CostEstimate(
            flops=int(10 * batch * num_classes * num_points),
            transcendentals=int(batch * (num_classes + 1) * num_points),
            bytes_accessed=int(logits.size * jnp.dtype(logits.dtype).itemsize
                               + score_labels.size * jnp.dtype(score_labels.dtype).itemsize
                               + gn * _SUBLANE * _LANE * 4)),
    )(logits_c, labels_c)

    nll_total = jnp.sum(cls_partials[:, 0, :])
    w_total = jnp.sum(cls_partials[:, 1, :])
    cls_loss = (nll_total / w_total) * jnp.float32(cls_weight)

    # -------------------------------------------- rotation / translation loss
    gt_r_c, nc_frame = _as_point_chunks(gt_r, num_frame_points)
    gt_t_c, _ = _as_point_chunks(gt_t, num_frame_points)
    score_c, _ = _as_point_chunks(score, num_frame_points)
    # The [:, :, :M] slice of the predictions is expressed through the chunk
    # index map (zero copy) when the layout allows; real points past M inside
    # the last visited chunk are cancelled by the zero-padded scene_score.
    pred_r_c, _ = _as_point_chunks(pred_r, num_frame_points, tail_masked=True)
    pred_t_c, _ = _as_point_chunks(pred_t, num_frame_points, tail_masked=True)

    bpc_frame = 4 * _LANE * batch * (2 * 9 + 2 * 3 + 1)
    tm, gm = _choose_chunk_tile(nc_frame, bpc_frame)

    frame_partials = pl.pallas_call(
        _frame_loss_kernel,
        grid=(gm,),
        in_specs=[
            pl.BlockSpec((batch, 9, tm, _LANE), lambda j: (0, 0, j, 0)),  # pred_R
            pl.BlockSpec((batch, 9, tm, _LANE), lambda j: (0, 0, j, 0)),  # gt_R
            pl.BlockSpec((batch, 3, tm, _LANE), lambda j: (0, 0, j, 0)),  # pred_t
            pl.BlockSpec((batch, 3, tm, _LANE), lambda j: (0, 0, j, 0)),  # gt_t
            pl.BlockSpec((batch, tm, _LANE), lambda j: (0, j, 0)),        # score
        ],
        out_specs=pl.BlockSpec((1, _SUBLANE, _LANE), lambda j: (j, 0, 0)),
        out_shape=jax.ShapeDtypeStruct((gm, _SUBLANE, _LANE), jnp.float32),
        compiler_params=pltpu.CompilerParams(
            dimension_semantics=("parallel",),
            vmem_limit_bytes=_VMEM_LIMIT),
        cost_estimate=pl.CostEstimate(
            flops=int(60 * batch * num_frame_points),
            transcendentals=0,
            bytes_accessed=int((2 * 9 + 2 * 3 + 1) * batch * num_frame_points * 4
                               + gm * _SUBLANE * _LANE * 4)),
    )(pred_r_c, gt_r_c, pred_t_c, gt_t_c, score_c)

    denom = jnp.float32(batch * num_frame_points)
    r_loss = (jnp.sum(frame_partials[:, 0, :]) / denom) * jnp.float32(r_weight)
    t_loss = (jnp.sum(frame_partials[:, 1, :]) / denom) * jnp.float32(t_weight)

    return {'cls_loss': cls_loss, 'R_loss': r_loss, 't_loss': t_loss}


def _reference_loss(preds, labels, *, neg_weight=0.1, r_weight=5.0,
                    t_weight=20.0, cls_weight=1.0):
    """Plain-JAX reference matching the PyTorch module (label_smoothing=0)."""
    logits = preds['scene_score_logits'].astype(jnp.float32)
    y = labels['scene_score_labels'].astype(jnp.int32)
    logp = jax.nn.log_softmax(logits, axis=1)
    tgt = jnp.take_along_axis(logp, y[:, None, :], axis=1)[:, 0, :]
    w = jnp.where(y == 0, jnp.float32(neg_weight), jnp.float32(1.0))
    cls = jnp.sum(-w * tgt) / jnp.sum(w)

    gt_r = labels['best_frame_R'].astype(jnp.float32)
    m = gt_r.shape[2]
    pr = preds['frame_R'][:, :, :m].astype(jnp.float32)
    sign = jnp.asarray(_R_FLIP_SIGN)
    r1 = jnp.mean((pr - gt_r) ** 2, axis=1)
    r2 = jnp.mean((pr - gt_r * sign) ** 2, axis=1)
    sc = labels['scene_score'][:, :m].astype(jnp.float32)
    r = jnp.mean(jnp.minimum(r1, r2) * sc)

    gt_t = labels['best_frame_t'].astype(jnp.float32)
    pt = preds['frame_t'][:, :, :m].astype(jnp.float32)
    t = jnp.mean(jnp.sum((pt - gt_t) ** 2, axis=1) * sc)

    return {'cls_loss': cls * cls_weight, 'R_loss': r * r_weight,
            't_loss': t * t_weight}


def _make_inputs(key, batch, num_classes, num_points, num_frame_points):
    ks = jax.random.split(key, 7)
    preds = {
        'scene_score_logits': jax.random.normal(
            ks[0], (batch, num_classes, num_points), jnp.float32),
        'frame_R': jax.random.normal(ks[1], (batch, 9, num_points), jnp.float32),
        'frame_t': jax.random.normal(ks[2], (batch, 3, num_points), jnp.float32),
    }
    labels = {
        'scene_score_labels': jax.random.randint(
            ks[3], (batch, num_points), 0, num_classes, jnp.int32),
        'best_frame_R': jax.random.normal(
            ks[4], (batch, 9, num_frame_points), jnp.float32),
        'best_frame_t': jax.random.normal(
            ks[5], (batch, 3, num_frame_points), jnp.float32),
        'scene_score': jax.random.uniform(
            ks[6], (batch, num_points), jnp.float32),
    }
    return preds, labels


if __name__ == "__main__":
    key = jax.random.PRNGKey(0)

    cases = [
        # (name, B, C, N, M)
        ("aligned_zero_copy_multistep", 2, 4, 4096, 2048),  # reshape-only path, grid >= 2
        ("unaligned_pad_and_mask",      2, 4,  500,  300),  # pad + in-kernel-mask path
    ]

    for name, B, C, N, M in cases:
        key, sub = jax.random.split(key)
        preds, labels = _make_inputs(sub, B, C, N, M)
        out = pointnet2_loss(preds, labels)
        ref = _reference_loss(preds, labels)
        jax.block_until_ready((out, ref))
        for lname in ('cls_loss', 'R_loss', 't_loss'):
            np.testing.assert_allclose(np.asarray(out[lname]),
                                       np.asarray(ref[lname]),
                                       rtol=1e-4, atol=1e-5,
                                       err_msg=f"{name}:{lname}")

    print("KERNEL_OK")
</pallas_src>

<mosaic_0001>
module attributes {stable_mosaic.version = 11 : i64} {
  func.func @_cls_loss_kernel(%arg0: i32, %arg1: memref<2x4x16x128xf32, #tpu.memory_space<vmem>>, %arg2: memref<2x16x128xi32, #tpu.memory_space<vmem>>, %arg3: memref<1x8x128xf32, #tpu.memory_space<vmem>>) attributes {dimension_semantics = [#tpu.dimension_semantics<parallel>], iteration_bounds = array<i64: 2>, scalar_prefetch = 0 : i64, scratch_operands = 0 : i64, tpu.core_type = #tpu.core_type<tc>, window_params = [{transform_indices = @transform_0, window_bounds = array<i64: 2, 4, 16, 128>}, {transform_indices = @transform_1, window_bounds = array<i64: 2, 16, 128>}, {transform_indices = @transform_2, window_bounds = array<i64: 1, 8, 128>}]} {
    %c0 = arith.constant 0 : index
    %c0_0 = arith.constant 0 : index
    %c0_1 = arith.constant 0 : index
    %c0_2 = arith.constant 0 : index
    %0 = vector.load %arg1[%c0, %c0_0, %c0_1, %c0_2] : memref<2x4x16x128xf32, #tpu.memory_space<vmem>>, vector<2x4x16x128xf32>
    %c0_3 = arith.constant 0 : index
    %c0_4 = arith.constant 0 : index
    %c0_5 = arith.constant 0 : index
    %1 = vector.load %arg2[%c0_3, %c0_4, %c0_5] : memref<2x16x128xi32, #tpu.memory_space<vmem>>, vector<2x16x128xi32>
    %cst = arith.constant dense<0xFF800000> : vector<2x16x128xf32>
    %2 = vector.multi_reduction <maximumf>, %0, %cst [1] : vector<2x4x16x128xf32> to vector<2x16x128xf32>
    %3 = vector.shape_cast %2 : vector<2x16x128xf32> to vector<2x1x16x128xf32>
    %4 = vector.broadcast %3 : vector<2x1x16x128xf32> to vector<2x4x16x128xf32>
    %5 = arith.subf %0, %4 : vector<2x4x16x128xf32>
    %6 = math.exp %5 : vector<2x4x16x128xf32>
    %cst_6 = arith.constant dense<0.000000e+00> : vector<2x16x128xf32>
    %7 = vector.multi_reduction <add>, %6, %cst_6 [1] : vector<2x4x16x128xf32> to vector<2x16x128xf32>
    %8 = math.log %7 : vector<2x16x128xf32>
    %9 = arith.addf %8, %2 : vector<2x16x128xf32>
    %10 = tpu.iota {dimensions = array<i32: 1>} : vector<1x4x1x1xi32>
    %11 = vector.shape_cast %1 : vector<2x16x128xi32> to vector<2x1x16x128xi32>
    %12 = vector.broadcast %10 : vector<1x4x1x1xi32> to vector<2x4x16x128xi32>
    %13 = vector.broadcast %11 : vector<2x1x16x128xi32> to vector<2x4x16x128xi32>
    %14 = arith.cmpi eq, %12, %13 : vector<2x4x16x128xi32>
    %15 = arith.extui %14 : vector<2x4x16x128xi1> to vector<2x4x16x128xi32>
    %16 = arith.sitofp %15 : vector<2x4x16x128xi32> to vector<2x4x16x128xf32>
    %17 = arith.mulf %0, %16 : vector<2x4x16x128xf32>
    %cst_7 = arith.constant dense<0.000000e+00> : vector<2x16x128xf32>
    %18 = vector.multi_reduction <add>, %17, %cst_7 [1] : vector<2x4x16x128xf32> to vector<2x16x128xf32>
    %c0_i32 = arith.constant 0 : i32
    %19 = vector.broadcast %c0_i32 : i32 to vector<2x16x128xi32>
    %20 = arith.cmpi slt, %1, %19 : vector<2x16x128xi32>
    %c0_i32_8 = arith.constant 0 : i32
    %21 = vector.broadcast %c0_i32_8 : i32 to vector<2x16x128xi32>
    %22 = arith.cmpi eq, %1, %21 : vector<2x16x128xi32>
    %cst_9 = arith.constant 1.000000e-01 : f32
    %cst_10 = arith.constant 1.000000e+00 : f32
    %23 = vector.broadcast %cst_9 : f32 to vector<2x16x128xf32>
    %24 = vector.broadcast %cst_10 : f32 to vector<2x16x128xf32>
    %25 = arith.select %22, %23, %24 : vector<2x16x128xi1>, vector<2x16x128xf32>
    %cst_11 = arith.constant 0.000000e+00 : f32
    %26 = vector.broadcast %cst_11 : f32 to vector<2x16x128xf32>
    %27 = arith.select %20, %26, %25 : vector<2x16x128xi1>, vector<2x16x128xf32>
    %28 = arith.subf %9, %18 : vector<2x16x128xf32>
    %29 = arith.mulf %27, %28 : vector<2x16x128xf32>
    %cst_12 = arith.constant dense<0.000000e+00> : vector<128xf32>
    %30 = vector.multi_reduction <add>, %29, %cst_12 [0, 1] : vector<2x16x128xf32> to vector<128xf32>
    %cst_13 = arith.constant dense<0.000000e+00> : vector<128xf32>
    %31 = vector.multi_reduction <add>, %27, %cst_13 [0, 1] : vector<2x16x128xf32> to vector<128xf32>
    %32 = vector.shape_cast %30 : vector<128xf32> to vector<1x1x128xf32>
    %c0_14 = arith.constant 0 : index
    %c0_15 = arith.constant 0 : index
    %c0_16 = arith.constant 0 : index
    %33 = vector.load %arg3[%c0_14, %c0_15, %c0_16] : memref<1x8x128xf32, #tpu.memory_space<vmem>>, vector<1x1x128xf32>
    tpu.vector_store %arg3[%c0_14, %c0_15, %c0_16], %32 {strides = array<i32>} : memref<1x8x128xf32, #tpu.memory_space<vmem>>, vector<1x1x128xf32>,
    %34 = vector.shape_cast %31 : vector<128xf32> to vector<1x1x128xf32>
    %c0_17 = arith.constant 0 : index
    %c1 = arith.constant 1 : index
    %c0_18 = arith.constant 0 : index
    %35 = vector.load %arg3[%c0_17, %c1, %c0_18] : memref<1x8x128xf32, #tpu.memory_space<vmem>>, vector<1x1x128xf32>
    tpu.vector_store %arg3[%c0_17, %c1, %c0_18], %34 {strides = array<i32>} : memref<1x8x128xf32, #tpu.memory_space<vmem>>, vector<1x1x128xf32>,
    return
  }
  func.func @transform_0(%arg0: i32) -> (i32, i32, i32, i32) {
    %c0_i32 = arith.constant 0 : i32
    %c0_i32_0 = arith.constant 0 : i32
    %c0_i32_1 = arith.constant 0 : i32
    %c0_i32_2 = arith.constant 0 : i32
    return %c0_i32, %c0_i32_0, %arg0, %c0_i32_1 : i32, i32, i32, i32
  }
  func.func @transform_1(%arg0: i32) -> (i32, i32, i32) {
    %c0_i32 = arith.constant 0 : i32
    %c0_i32_0 = arith.constant 0 : i32
    %c0_i32_1 = arith.constant 0 : i32
    return %c0_i32, %arg0, %c0_i32_0 : i32, i32, i32
  }
  func.func @transform_2(%arg0: i32) -> (i32, i32, i32) {
    %c0_i32 = arith.constant 0 : i32
    %c0_i32_0 = arith.constant 0 : i32
    %c0_i32_1 = arith.constant 0 : i32
    return %arg0, %c0_i32, %c0_i32_0 : i32, i32, i32
  }
}

</mosaic_0001>

<bundles_post_ra>
// kernel: tpu_custom_call.1
= control target key start
LH: loop header
LB: loop body
LE: loop exit
PB: predicated region body
PF: predicated region fallthrough
CT: control target
= control target key end

     0   :  { %7 = vsyncpa [#allocation3], 0  ;;  %s1191_s0 = inlined_call_operand.hbm [shape: f32[2,4,32,128], index: 0, kind: input, shape index: {}]   ;;  %s1192_s1 = inlined_call_operand.hbm [shape: s32[2,32,128], index: 1, kind: input, shape index: {}]   ;;  %s1193_s2 = inlined_call_operand.hbm [shape: f32[2,8,128], index: 2, kind: output, shape index: {}]  }
   0x1   :  { %9 = vsyncpa [#allocation3 + $0x1], 0 }
   0x2   :  { %10 = vsyncpa [#allocation6], 0 }
   0x3   :  { %12 = vsyncpa [#allocation6 + $0x1], 0 }
   0x4   :  { %13 = vsyncpa [#allocation4], 0 }
   0x5   :  { %15 = vsyncpa [#allocation4 + $0x1], 0  ;;  %s831_s9 = smov 0   ;;  %s833_s10 = smov 0  }
   0x6   :  { %s835_s11 = smov 0   ;;  %s837_s12 = smov 0  }
   0x7 LB: > { %s852_s13 = sadd.s32 4294967295, %s799_s12   ;;  %s581_s14 = sadd.s32 4294967294, %s799_s12   ;;  %s799_s12 = sphi %s837_s12, %s1203_s12   ;;  %s795_s11 = sphi %s835_s11, %s1202_s11   ;;  %s791_s10 = sphi %s833_s10, %s1201_s10   ;;  %s787_s9 = sphi %s831_s9, %s1200_s9  }
   0x8   : > { %s856_s15 = sadd.s32 1, %s799_s12   ;;  %s28_s16 = sadd.s32 1, %s795_s11 }
   0x9   : > { %s25_s17 = ssub.s32 %s799_s12, %s856_s15  ;;  %p35_p0 = scmp.ne.s32.totalorder %s795_s11, %s791_s10 }
   0xa   : > { %p26_p1 = scmp.eq.s32.totalorder %s25_s17, 0  ;;  %p36_p2 = scmp.eq.s32.totalorder %s799_s12, 0 }
   0xb   : > { %p41_p3 = scmp.ne.s32.totalorder %s791_s10, %s787_s9  ;;  %p42_p4 = scmp.eq.s32.totalorder %s852_s13, 0 }
   0xc   : > { %s868_s18 = scalar_select %p26_p1, %s795_s11, %s28_s16  }
   0xd   : > { %p870_p5 = por %p36_p2, %p35_p0  ;;  %p874_p6 = por %p42_p4, %p41_p3 }
   0xe   : > { %p91_p7 = scmp.eq.s32.totalorder %s852_s13, 1  ;;  %p97_p8 = scmp.eq.s32.totalorder %s581_s14, 1 }
   0xf   : > { %p1194_p11 = scmp.ge.s32.totalorder %s799_s12, 2 }
  0x10   : > { %p879_p9 = por %p91_p7, %p35_p0  ;;  %p883_p10 = por %p97_p8, %p41_p3 }
  0x11   : > { %113 = sbr.rel (%p1194_p11) target bundleno = 47 (0x2f), region = 16 }
  0x16   : > { %s891_s23 = sand.u32 1, %s795_s11   ;;  %s618_s24 = sshll.u32 %s799_s12, 8 }
  0x17   : > { %s584_s25 = sshll.u32 %s891_s23, 7  ;;  %s127_s28 = scalar_lea.hbm %s1191_s0, %s618_s24 }
  0x18   : > { %s620_s29 = scalar_select %p870_p5, [#allocation0], [#allocation12] }
  0x19   : > { %s121_s30 = scalar_lea.vmem [#allocation2], %s584_s25  ;;  %s801_s5 = smov 512  }
  0x1a   : > { %s140_s3 = sshll.u32 %s121_s30, 4  ;;  %s132_s4 = sld [smem:[%s620_s29]]   ;;  %s141_s3 = int_to_ptr.vmem [resolvable:$true] %s140_s3 }
  0x1b   : > { %621 = sst [smem:[#allocation9]] (%p870_p5), %s801_s5  ;;  %s802_s6 = smov 256  }
  0x1c   : > { %622 = sst [smem:[#allocation9 + $0x1]] (%p870_p5), %s802_s6  ;;  %s803_s7 = smov 2  }
  0x1d   : > { %623 = sst [smem:[#allocation9 + $0x2]] (%p870_p5), %s803_s7  ;;  %s804_s8 = smov 128  }
  0x1e   : > { %624 = sst [smem:[#allocation9 + $0x3]] (%p870_p5), %s804_s8  ;;  %s805_s16 = smov 8  }
  0x1f   : > { %625 = sst [smem:[#allocation9 + $0x4]] (%p870_p5), %s804_s8  ;;  %s118_s25 = scalar_lea.sflag [#allocation3], %s891_s23 }
  0x20   : > { %s587_s14 = sshll.u32 %s132_s4, 26  ;;  %626 = sst [smem:[#allocation9 + $0x5]] (%p870_p5), %s805_s16 }
  0x21   : > { %s588_s17 = sadd.s32 134217728, %s587_s14  ;;  %s806_s26 = smov 131072  }
  0x22   : > { %627 = dma.general (%p870_p5), %s127_s28, 2048, %s141_s3, %s118_s25, %s806_s26, [#allocation9], %s588_s17, 0  }
  0x23   : > { %s589_s27 = sshll.u32 %s891_s23, 5  ;;  %s173_s4 = scalar_lea.hbm %s1192_s1, %s618_s24 }
  0x24   : > { %s628_s5 = scalar_select %p870_p5, [#allocation0], [#allocation13] }
  0x25   : > { %s167_s6 = scalar_lea.vmem [#allocation5], %s589_s27  ;;  %s807_s28 = smov 512  }
  0x26   : > { %s186_s7 = sshll.u32 %s167_s6, 4  ;;  %s178_s8 = sld [smem:[%s628_s5]]   ;;  %s187_s7 = int_to_ptr.vmem [resolvable:$true] %s186_s7 }
  0x27   : > { %629 = sst [smem:[#allocation11]] (%p870_p5), %s807_s28  ;;  %s808_s3 = smov 256  }
  0x28   : > { %630 = sst [smem:[#allocation11 + $0x1]] (%p870_p5), %s808_s3  ;;  %s809_s14 = smov 2  }
  0x29   : > { %631 = sst [smem:[#allocation11 + $0x2]] (%p870_p5), %s809_s14  ;;  %s810_s16 = smov 128  }
  0x2a   : > { %632 = sst [smem:[#allocation11 + $0x3]] (%p870_p5), %s810_s16  ;;  %s811_s17 = smov 8  }
  0x2b   : > { %633 = sst [smem:[#allocation11 + $0x4]] (%p870_p5), %s810_s16  ;;  %s164_s26 = scalar_lea.sflag [#allocation6], %s891_s23 }
  0x2c   : > { %s592_s24 = sshll.u32 %s178_s8, 26  ;;  %634 = sst [smem:[#allocation11 + $0x5]] (%p870_p5), %s811_s17 }
  0x2d   : > { %s593_s25 = sadd.s32 134217728, %s592_s24  ;;  %s812_s27 = smov 131072  }
  0x2e   : > { %635 = dma.general (%p870_p5), %s173_s4, 512, %s187_s7, %s164_s26, %s812_s27, [#allocation11], %s593_s25, 0  }
  0x2f PF: > { %p594_p12 = scmp.ge.s32.totalorder %s799_s12, 1  ;;  %p207_p13 = scmp.lt.s32.totalorder %s799_s12, 3 }
  0x31   : > { %p208_p0 = pnand %p594_p12, %p207_p13 }
  0x32   : > { %s939_s29 = sand.u32 (!%p208_p0), 1, %s791_s10  }
  0x33   : > { %211 = sbr.rel (%p208_p0) target bundleno = 153 (0x99), region = 28  ;;  %s595_s30 = sshll.u32 (!%p208_p0), %s939_s29, 7 }
  0x34   : > { %s214_s5 = scalar_lea.sflag (!%p208_p0), [#allocation3], %s939_s29  ;;  %s217_s6 = scalar_lea.vmem (!%p208_p0), [#allocation2], %s595_s30 }
  0x38   : > { %774 = dma.done.wait (%p874_p6), %s214_s5, 2048  }
  0x39   : > { %776 = vsyncadd (%p874_p6), %s214_s5, 4294965248  ;;  %s596_s19 = sshll.u32 %s939_s29, 5  ;;  %s223_s23 = scalar_lea.sflag [#allocation6], %s939_s29 }
  0x3a   : > { %s949_s4 = scalar_lea.vmem [#allocation5], %s596_s19 }
  0x3b   : > { %778 = dma.done.wait (%p874_p6), %s223_s23, 512  }
  0x3c   : > { %780 = vsyncadd (%p874_p6), %s223_s23, 4294966784  ;;  %v955_v0 = vld [vmem:[%s217_s6] sm:$0xff]  ;;  %v957_v1 = vld [vmem:[%s217_s6 + $0x8] sm:$0xff]  ;;  %s597_s20 = sshll.u32 %s939_s29, 3  ;;  %s615_s28 = sshll.u32 %s852_s13, 7 }
  0x3d   : > { %v959_v2 = vld [vmem:[%s217_s6 + $0x10] sm:$0xff]  ;;  %v961_v3 = vld [vmem:[%s217_s6 + $0x18] sm:$0xff]  ;;  %v963_v4 = vld [vmem:[%s217_s6 + $0x20] sm:$0xff]  ;;  %s251_s7 = scalar_lea.vmem [#allocation7], %s597_s20  ;;  %s486_s16 = scalar_lea.hbm %s1193_s2, %s615_s28 }
  0x3e   : > { %v965_v5 = vld [vmem:[%s217_s6 + $0x28] sm:$0xff]  ;;  %v274_v6 = vmax.f32 %v955_v0, %v959_v2  ;;  %v969_v7 = vld [vmem:[%s217_s6 + $0x30] sm:$0xff]  ;;  %v971_v8 = vld [vmem:[%s217_s6 + $0x38] sm:$0xff]  ;;  %v277_v10 = vmax.f32 %v957_v1, %v961_v3  ;;  %s488_s8 = sshll.u32 %s251_s7, 4  ;;  %s475_s24 = scalar_lea.sflag [#allocation4], %s939_s29  ;;  %s489_s8 = int_to_ptr.vmem [resolvable:$true] %s488_s8 }
  0x3f   : > { %v973_v9 = vld [vmem:[%s217_s6 + $0x40] sm:$0xff]  ;;  %v977_v11 = vld [vmem:[%s217_s6 + $0x48] sm:$0xff]  ;;  %v979_v12 = vld [vmem:[%s217_s6 + $0x50] sm:$0xff]  ;;  %s731_s17 = scalar_lea.vmem %s489_s8, 128  ;;  %s815_s25 = smov [#allocation7]  }
  0x40   : > { %v981_v13 = vld [vmem:[%s217_s6 + $0x58] sm:$0xff]  ;;  %v275_v14 = vmax.f32 %v274_v6, %v963_v4  ;;  %v984_v15 = vld [vmem:[%s217_s6 + $0x60] sm:$0xff]  ;;  %v986_v16 = vld [vmem:[%s217_s6 + $0x68] sm:$0xff]  ;;  %v278_v17 = vmax.f32 %v277_v10, %v965_v5  ;;  %v280_v18 = vmax.f32 %v973_v9, %v979_v12  ;;  %p732_p1 = scmp.ne.s32.totalorder %s489_s8, %s731_s17  ;;  %s735_s26 = sshll.u32 %s815_s25, 4  ;;  %s736_s26 = int_to_ptr.vmem [resolvable:$false] %s735_s26 }
  0x41   : > { %v283_v19 = vmax.f32 %v977_v11, %v981_v13  ;;  %v993_v20 = vld [vmem:[%s217_s6 + $0x70] sm:$0xff]  ;;  %v998_v22 = vld [vmem:[%s217_s6 + $0x78] sm:$0xff]  ;;  %v1044_v61 = vld [vmem:[%s949_s4] sm:$0xff]  ;;  %s737_s27 = scalar_lea.vmem %s736_s26, 256  ;;  %p738_p4 = scmp.lt.s32.totalorder %s489_s8, %s736_s26 }
  0x42   : > { %v996_v21 = vmax.f32 %v275_v14, %v969_v7  ;;  %v1001_v23 = vmax.f32 %v278_v17, %v971_v8  ;;  %v281_v24 = vmax.f32 %v280_v18, %v984_v15  ;;  %v1047_v62 = vld [vmem:[%s949_s4 + $0x8] sm:$0xff]  ;;  %v1050_v10 = vld [vmem:[%s949_s4 + $0x10] sm:$0xff]  ;;  %v1053_v18 = vld [vmem:[%s949_s4 + $0x18] sm:$0xff]  ;;  %vm358_vm0 = vcmp.eq.s32.totalorder %v1044_v61, 0  ;;  %p733_p2 = pnand %p732_p1, %p879_p9  ;;  %p739_p5 = scmp.lt.s32.totalorder %s737_s27, %s731_s17 }
  0x43   : > { %v284_v25 = vmax.f32 %v283_v19, %v986_v16  ;;  %vm359_vm1 = vcmp.eq.s32.totalorder %v1047_v62, 0  ;;  %vm360_vm2 = vcmp.eq.s32.totalorder %v1044_v61, 1  ;;  %vm361_vm3 = vcmp.eq.s32.totalorder %v1047_v62, 1 }
  0x44   : > { %v286_v26 = vsub.f32 %v955_v0, %v996_v21  ;;  %v288_v27 = vsub.f32 %v959_v2, %v996_v21  ;;  %v1010_v28 = vmax.f32 %v281_v24, %v993_v20  ;;  %v287_v29 = vsub.f32 %v957_v1, %v1001_v23  ;;  %p734_p3 = pneg %p733_p2  ;;  %p740_p6 = por %p739_p5, %p738_p4 }
  0x45   : > { %v289_v30 = vsub.f32 %v961_v3, %v1001_v23  ;;  %v290_v31 = vsub.f32 %v963_v4, %v996_v21  ;;  %v1019_v32 = vmax.f32 %v284_v25, %v998_v22  ;;  %v291_v33 = vsub.f32 %v965_v5, %v1001_v23 }
  0x46   : > { %v302_v34 = vmul.f32 1.442695, %v286_v26  ;;  %v306_v35 = vmul.f32 1.442695, %v288_v27  ;;  %v292_v36 = vsub.f32 %v969_v7, %v996_v21  ;;  %v293_v37 = vsub.f32 %v971_v8, %v1001_v23  ;;  %p741_p7 = pnand %p740_p6, %p734_p3 }
  0x47   : > { %v294_v38 = vsub.f32 %v973_v9, %v1010_v28  ;;  %v304_v39 = vmul.f32 1.442695, %v287_v29  ;;  %v308_v40 = vmul.f32 1.442695, %v289_v30  ;;  %v310_v41 = vmul.f32 1.442695, %v290_v31 }
  0x48   : > { %691 = vpow2.f32 %v302_v34  ;;  %v295_v42 = vsub.f32 %v977_v11, %v1019_v32  ;;  %v312_v43 = vmul.f32 1.442695, %v291_v33  ;;  %v296_v44 = vsub.f32 %v979_v12, %v1010_v28 }
  0x49   : > { %693 = vpow2.f32 %v306_v35  ;;  %v314_v45 = vmul.f32 1.442695, %v292_v36  ;;  %v297_v46 = vsub.f32 %v981_v13, %v1019_v32  ;;  %v316_v47 = vmul.f32 1.442695, %v293_v37 }
  0x4a   : > { %695 = vpow2.f32 %v304_v39  ;;  %v298_v48 = vsub.f32 %v984_v15, %v1010_v28  ;;  %v318_v49 = vmul.f32 1.442695, %v294_v38  ;;  %v299_v50 = vsub.f32 %v986_v16, %v1019_v32 }
  0x4b   : > { %697 = vpow2.f32 %v308_v40  ;;  %v320_v51 = vmul.f32 1.442695, %v295_v42  ;;  %v300_v52 = vsub.f32 %v993_v20, %v1010_v28  ;;  %v322_v53 = vmul.f32 1.442695, %v296_v44 }
  0x4c   : > { %699 = vpow2.f32 %v310_v41  ;;  %v301_v54 = vsub.f32 %v998_v22, %v1019_v32  ;;  %v324_v55 = vmul.f32 1.442695, %v297_v46  ;;  %v326_v56 = vmul.f32 1.442695, %v298_v48 }
  0x4d   : > { %701 = vpow2.f32 %v312_v43  ;;  %v328_v57 = vmul.f32 1.442695, %v299_v50  ;;  %v330_v58 = vmul.f32 1.442695, %v300_v52  ;;  %vm362_vm4 = vcmp.eq.s32.totalorder %v1044_v61, 2 }
  0x4e   : > { %703 = vpow2.f32 %v314_v45  ;;  %v332_v59 = vmul.f32 1.442695, %v301_v54  ;;  %vm363_vm5 = vcmp.eq.s32.totalorder %v1047_v62, 2  ;;  %vm364_vm6 = vcmp.eq.s32.totalorder %v1044_v61, 3 }
  0x4f   : > { %705 = vpow2.f32 %v316_v47  ;;  %vm365_vm7 = vcmp.eq.s32.totalorder %v1047_v62, 3  ;;  %vm366_vm8 = vcmp.eq.s32.totalorder %v1050_v10, 0  ;;  %vm367_vm9 = vcmp.eq.s32.totalorder %v1053_v18, 0 }
  0x50   : > { %707 = vpow2.f32 %v318_v49  ;;  %vm368_vm10 = vcmp.eq.s32.totalorder %v1050_v10, 1  ;;  %vm369_vm11 = vcmp.eq.s32.totalorder %v1053_v18, 1  ;;  %v813_v33 = vmov 0.0  }
  0x51   : > { %709 = vpow2.f32 %v320_v51  ;;  %v598_v34 = vsel %vm358_vm0, 1.0, %v813_v33  ;;  %v599_v35 = vsel %vm359_vm1, 1.0, %v813_v33  ;;  %v600_v36 = vsel %vm360_vm2, 1.0, %v813_v33 }
  0x52   : > { %711 = vpow2.f32 %v322_v53  ;;  %vm370_vm12 = vcmp.eq.s32.totalorder %v1050_v10, 2  ;;  %v601_v39 = vsel %vm361_vm3, 1.0, %v813_v33  ;;  %v602_v40 = vsel %vm362_vm4, 1.0, %v813_v33 }
  0x53   : > { %713 = vpow2.f32 %v324_v55  ;;  %v603_v41 = vsel %vm363_vm5, 1.0, %v813_v33  ;;  %v604_v43 = vsel %vm364_vm6, 1.0, %v813_v33  ;;  %v605_v44 = vsel %vm365_vm7, 1.0, %v813_v33 }
  0x54   : > { %715 = vpow2.f32 %v326_v56  ;;  %v606_v45 = vsel %vm366_vm8, 1.0, %v813_v33  ;;  %vm371_vm13 = vcmp.eq.s32.totalorder %v1053_v18, 2  ;;  %v608_v47 = vsel %vm368_vm10, 1.0, %v813_v33 }
  0x55   : > { %v692_v60 = vpop.eup %691  ;;  %717 = vpow2.f32 %v328_v57  ;;  %v406_v48 = vmul.f32 %v598_v34, %v955_v0  ;;  %v408_v49 = vmul.f32 %v600_v36, %v959_v2  ;;  %v407_v52 = vmul.f32 %v599_v35, %v957_v1 }
  0x56   : > { %v694_v63 = vpop.eup %693  ;;  %719 = vpow2.f32 %v330_v58  ;;  %vm434_vm14 = vcmp.lt.s32.totalorder %v1044_v61, 0  ;;  %vm435_vm15 = vcmp.lt.s32.totalorder %v1047_v62, 0  ;;  %vm372_vm2 = vcmp.eq.s32.totalorder %v1050_v10, 3 }
  0x57   : > { %v696_v6 = vpop.eup %695  ;;  %721 = vpow2.f32 %v332_v59  ;;  %v334_v14 = vadd.f32 %v694_v63, %v692_v60  ;;  %v409_v55 = vmul.f32 %v601_v39, %v961_v3  ;;  %v410_v56 = vmul.f32 %v602_v40, %v963_v4 }
  0x58   : > { %v698_v17 = vpop.eup %697  ;;  %v814_v57 = vmov 1.0   ;;  %vm436_vm3 = vcmp.lt.s32.totalorder %v1050_v10, 0  ;;  %v607_v61 = vsel %vm367_vm9, 1.0, %v813_v33  ;;  %v609_v62 = vsel %vm369_vm11, 1.0, %v813_v33 }
  0x59   : > { %v700_v19 = vpop.eup %699  ;;  %v337_v24 = vadd.f32 %v698_v17, %v696_v6  ;;  %v438_v0 = vsel %vm358_vm0, 0.1, %v814_v57  ;;  %v439_v1 = vsel %vm359_vm1, 0.1, %v814_v57  ;;  %v440_v59 = vsel %vm366_vm8, 0.1, %v814_v57 }
  0x5a   : > { %v702_v25 = vpop.eup %701  ;;  %v335_v26 = vadd.f32 %v700_v19, %v334_v14  ;;  %v422_v6 = vadd.f32 %v408_v49, %v406_v48  ;;  %v442_v3 = vsel %vm434_vm14, 0.0, %v438_v0  ;;  %v443_v4 = vsel %vm435_vm15, 0.0, %v439_v1 }
  0x5b   : > { %v704_v27 = vpop.eup %703  ;;  %v338_v29 = vadd.f32 %v702_v25, %v337_v24  ;;  %vm437_vm0 = vcmp.lt.s32.totalorder %v1053_v18, 0  ;;  %v441_v19 = vsel %vm367_vm9, 0.1, %v814_v57  ;;  %v463_v24 = vadd.f32 %v443_v4, %v442_v3 }
  0x5c   : > { %v706_v30 = vpop.eup %705  ;;  %v336_v31 = vadd.f32 %v704_v27, %v335_v26  ;;  %v411_v26 = vmul.f32 %v603_v41, %v965_v5  ;;  %v425_v27 = vadd.f32 %v409_v55, %v407_v52  ;;  %v416_v34 = vmul.f32 %v608_v47, %v979_v12 }
  0x5d   : > { %v708_v37 = vpop.eup %707  ;;  %v339_v38 = vadd.f32 %v706_v30, %v338_v29  ;;  %v444_v29 = vsel %vm436_vm3, 0.0, %v440_v59  ;;  %v445_v5 = vsel %vm437_vm0, 0.0, %v441_v19  ;;  %v610_v35 = vsel %vm370_vm12, 1.0, %v813_v33 }
  0x5e   : > { %v710_v42 = vpop.eup %709  ;;  %723 = vlog2.f32 %v336_v31  ;;  %v464_v30 = vadd.f32 %v463_v24, %v444_v29  ;;  %v414_v31 = vmul.f32 %v606_v45, %v973_v9  ;;  %v412_v36 = vmul.f32 %v604_v43, %v969_v7 }
  0x5f   : > { %v712_v46 = vpop.eup %711  ;;  %725 = vlog2.f32 %v339_v38  ;;  %v413_v39 = vmul.f32 %v605_v44, %v971_v8  ;;  %v415_v40 = vmul.f32 %v607_v61, %v977_v11  ;;  %v417_v41 = vmul.f32 %v609_v62, %v981_v13 }
  0x60   : > { %v714_v50 = vpop.eup %713  ;;  %v340_v51 = vadd.f32 %v712_v46, %v708_v37  ;;  %v423_v37 = vadd.f32 %v422_v6, %v410_v56  ;;  %v465_v38 = vadd.f32 %v464_v30, %v445_v5  ;;  %v611_v9 = vsel %vm371_vm13, 1.0, %v813_v33 }
  0x61   : > { %v716_v53 = vpop.eup %715  ;;  %v343_v54 = vadd.f32 %v714_v50, %v710_v42  ;;  %v426_v42 = vadd.f32 %v425_v27, %v411_v26  ;;  %vm373_vm1 = vcmp.eq.s32.totalorder %v1053_v18, 3  ;;  %v418_v46 = vmul.f32 %v610_v35, %v984_v15 }
  0x62   : > { %v718_v2 = vpop.eup %717  ;;  %v341_v58 = vadd.f32 %v716_v53, %v340_v51  ;;  %v466_v12 = vrot.slane %v465_v38, 4  ;;  %v428_v7 = vadd.f32 %v416_v34, %v414_v31  ;;  %v612_v8 = vsel %vm372_vm2, 1.0, %v813_v33 }
  0x63   : > { %v720_v60 = vpop.eup %719  ;;  %v344_v63 = vadd.f32 %v718_v2, %v343_v54  ;;  %v424_v11 = vadd.f32 %v423_v37, %v412_v36  ;;  %v419_v48 = vmul.f32 %v611_v9, %v986_v16  ;;  %v427_v49 = vadd.f32 %v426_v42, %v413_v39 }
  0x64   : > { %v722_v14 = vpop.eup %721  ;;  %v342_v17 = vadd.f32 %v720_v60, %v341_v58  ;;  %v467_v13 = vadd.f32 %v466_v12, %v465_v38  ;;  %v431_v50 = vadd.f32 %v417_v41, %v415_v40  ;;  %v613_v18 = vsel %vm373_vm1, 1.0, %v813_v33 }
  0x65   : > { %v345_v25 = vadd.f32 %v722_v14, %v344_v63  ;;  %v420_v53 = vmul.f32 %v612_v8, %v993_v20  ;;  %v429_v54 = vadd.f32 %v428_v7, %v418_v46  ;;  %v421_v56 = vmul.f32 %v613_v18, %v998_v22 }
  0x66   : > { %727 = vlog2.f32 %v342_v17  ;;  %v468_v15 = vrot.slane %v467_v13, 2  ;;  %v432_v57 = vadd.f32 %v431_v50, %v419_v48 }
  0x67   : > { %729 = vlog2.f32 %v345_v25  ;;  %v430_v58 = vadd.f32 %v429_v54, %v420_v53 }
  0x68   : > { %v469_v55 = vadd.f32 %v468_v15, %v467_v13 }
  0x6a   : > { %v470_v16 = vrot.slane %v469_v55, 1 }
  0x6b   : > { %v724_v45 = vpop.eup %723 }
  0x6c   : > { %v726_v43 = vpop.eup %725  ;;  %v347_v47 = vmul.f32 0.6931472, %v724_v45  ;;  %v471_v60 = vadd.f32 %v470_v16, %v469_v55 }
  0x6d   : > { %v349_v44 = vmul.f32 0.6931472, %v726_v43 }
  0x6e   : > { %v354_v51 = vadd.f32 %v347_v47, %v996_v21  ;;  %473 = vst [vmem:[%s251_s7 + $0x1] sm:$0x1] %v471_v60 }
  0x6f   : > { %v355_v52 = vadd.f32 %v349_v44, %v1001_v23  ;;  %v433_v23 = vadd.f32 %v432_v57, %v421_v56 }
  0x70   : > { %v446_v10 = vsub.f32 %v354_v51, %v424_v11 }
  0x71   : > { %v447_v0 = vsub.f32 %v355_v52, %v427_v49 }
  0x72   : > { %v450_v59 = vmul.f32 %v446_v10, %v442_v3 }
  0x73   : > { %v728_v2 = vpop.eup %727  ;;  %v451_v33 = vmul.f32 %v447_v0, %v443_v4 }
  0x74   : > { %v730_v1 = vpop.eup %729  ;;  %v351_v21 = vmul.f32 0.6931472, %v728_v2 }
  0x75   : > { %v353_v63 = vmul.f32 0.6931472, %v730_v1  ;;  %v454_v14 = vadd.f32 %v451_v33, %v450_v59 }
  0x76   : > { %v356_v20 = vadd.f32 %v351_v21, %v1010_v28 }
  0x77   : > { %v357_v6 = vadd.f32 %v353_v63, %v1019_v32 }
  0x78   : > { %v448_v22 = vsub.f32 %v356_v20, %v430_v58 }
  0x79   : > { %v449_v17 = vsub.f32 %v357_v6, %v433_v23 }
  0x7a   : > { %v452_v19 = vmul.f32 %v448_v22, %v444_v29 }
  0x7b   : > { %v453_v24 = vmul.f32 %v449_v17, %v445_v5 }
  0x7c   : > { %v455_v25 = vadd.f32 %v454_v14, %v452_v19 }
  0x7e   : > { %v456_v3 = vadd.f32 %v455_v25, %v453_v24 }
  0x80   : > { %v457_v4 = vrot.slane %v456_v3, 4 }
  0x82   : > { %v458_v26 = vadd.f32 %v457_v4, %v456_v3 }
  0x84   : > { %v459_v27 = vrot.slane %v458_v26, 2 }
  0x86   : > { %v460_v61 = vadd.f32 %v459_v27, %v458_v26 }
  0x88   : > { %v461_v28 = vrot.slane %v460_v61, 1 }
  0x8a   : > { %v462_v62 = vadd.f32 %v461_v28, %v460_v61 }
  0x8c   : > { %472 = vst [vmem:[%s251_s7] sm:$0x1] %v462_v62 }
  0x8d   : > { %744 = shalt.err (!%p741_p7)
}
  0x8e   : > { %s745_s13 = scalar_lea.hbm %s486_s16, 128  ;;  %s749_s5 = scalar_lea.hbm %s1193_s2, 256 }
  0x8f   : > { %p746_p8 = scmp.ne.s32.totalorder %s486_s16, %s745_s13  ;;  %p750_p0 = scmp.lt.s32.totalorder %s486_s16, %s1193_s2 }
  0x90   : > { %p751_p1 = scmp.lt.s32.totalorder %s749_s5, %s745_s13 }
  0x91   : > { %p747_p12 = pnand %p746_p8, %p879_p9 }
  0x92   : > { %p752_p2 = por %p751_p1, %p750_p0 }
  0x93   : > { %p748_p13 = pneg %p747_p12 }
  0x95   : > { %p753_p11 = pnand %p752_p2, %p748_p13 }
  0x97   : > { %756 = shalt.err (!%p753_p11)
}
  0x98   : > { %638 = dma.vmem_to_hbm [thread:$0]  (%p879_p9), %s489_s8, 128, %s486_s16, %s475_s24  }
  0x99 PF: > { %s500_s23 = sand.u32 1, %s787_s9   ;;  %p1199_p3 = scmp.ge.s32.totalorder %s799_s12, 2 }
  0x9a   : > { %s501_s4 = scalar_lea.sflag [#allocation4], %s500_s23 }
  0x9b   : > { %p641_p4 = pnand %p1199_p3, %p883_p10 }
  0x9d   : > { %p642_p5 = pneg %p641_p4 }
  0x9f   : > { %782 = dma.done.wait (%p642_p5), %s501_s4, 128  }
  0xa0   : > { %784 = vsyncadd (%p642_p5), %s501_s4, 4294967168  ;;  %p18_p11 = scmp.ge.s32.totalorder %s856_s15, 4   ;;  %s1200_s9 = smov %s791_s10 }
  0xa1   : > { %s1201_s10 = smov %s795_s11  ;;  %s1202_s11 = smov %s868_s18 }
  0xa2   : > { %s1203_s12 = smov %s856_s15  ;;  %20 = sbr.rel (!%p18_p11) target bundleno = 7 (0x7), region = 96 }
  0xa7   :  { %506 = vsyncpa [#allocation3], 1 }
  0xa8   :  { %508 = vsyncpa [#allocation3 + $0x1], 1 }
  0xa9   :  { %509 = vsyncpa [#allocation6], 1 }
  0xaa   :  { %511 = vsyncpa [#allocation6 + $0x1], 1 }
  0xab   :  { %512 = vsyncpa [#allocation4], 1 }
  0xac   :  { %514 = vsyncpa [#allocation4 + $0x1], 1 }

</bundles_post_ra>
